<compile_context>
chip_gen: v7x
topology: tpu7x:2x2x1
jax: 0.10.0
libtpu: 0.0.40
codegen_flags: <defaults>
</compile_context>

<pallas_src>
import functools

import jax
import jax.numpy as jnp
from jax.experimental import pallas as pl
from jax.experimental.pallas import tpu as pltpu

_SUBLANE = 8


def _round_up(v, m):
    return (v + m - 1) // m * m


@functools.lru_cache(maxsize=1)
def _vmem_budget_bytes():
    """~75% of physical VMEM, generation aware; conservative fallback."""
    try:
        cap = int(pltpu.get_tpu_info().vmem_capacity_bytes)
    except Exception:
        cap = 64 << 20  # assume the smallest generation (v7x per-core)
    return max(32 << 20, (cap * 3) // 4)


def _const_spec(shape):
    """VMEM-resident block (constant index_map); single-buffered if supported."""
    index_map = lambda i: (0, 0)
    try:
        return pl.BlockSpec(shape, index_map, pipeline_mode=pl.Buffered(1))
    except (TypeError, AttributeError):
        return pl.BlockSpec(shape, index_map)


# ---------------------------------------------------------------- kernels ---
def _feature_block(x_ref, wf_ref, bf_ref):
    x = x_ref[...].astype(wf_ref.dtype)                         # [TB, D_in] bf16
    feat = jnp.dot(x, wf_ref[...], preferred_element_type=jnp.float32)
    return jnp.maximum(feat + bf_ref[...], 0.0)                 # [TB, F] f32


def _regress_kernel_with_feature(x_ref, wf_ref, bf_ref, wh_ref, bh_ref,
                                 y_ref, feat_ref):
    feat = _feature_block(x_ref, wf_ref, bf_ref)
    feat_lo = feat.astype(feat_ref.dtype)                       # bf16 feature out
    feat_ref[...] = feat_lo
    y = jnp.dot(feat_lo.astype(wh_ref.dtype), wh_ref[...],
                preferred_element_type=jnp.float32)
    y_ref[...] = (y + bh_ref[...]).astype(y_ref.dtype)


def _regress_kernel_no_feature(x_ref, wf_ref, bf_ref, wh_ref, bh_ref, y_ref):
    feat = _feature_block(x_ref, wf_ref, bf_ref)
    y = jnp.dot(feat.astype(wh_ref.dtype), wh_ref[...],
                preferred_element_type=jnp.float32)
    y_ref[...] = (y + bh_ref[...]).astype(y_ref.dtype)


# ---------------------------------------------------------------- wrapper ---
def prepare_regress_params(w_feat, b_feat, w_fc, b_fc,
                           compute_dtype=jnp.bfloat16):
    """One-time parameter preparation (model init, NOT per forward call).

    Weights are given already transposed relative to PyTorch nn.Linear
    ([out, in] -> [in, out]).  They are cast to the bf16 compute dtype
    (MXU-native on v5e/v6e/v7x); biases stay f32 and become (1, N) rows.
    """
    return (jnp.asarray(w_feat, compute_dtype),
            jnp.asarray(b_feat, jnp.float32).reshape(1, -1),
            jnp.asarray(w_fc, compute_dtype),
            jnp.asarray(b_fc, jnp.float32).reshape(1, -1))


@functools.partial(jax.jit, static_argnames=("return_feature", "batch_tile"))
def regress_forward(x, w_feat, b_feat, w_fc, b_fc,
                    return_feature=False, batch_tile=1024):
    """x: [B, D_in]; w_feat: [D_in, F] bf16; b_feat: [1, F] f32;
    w_fc: [F, H] bf16; b_fc: [1, H] f32 (outputs of prepare_regress_params)."""
    B, D_in = x.shape
    F_dim = w_feat.shape[1]
    H = w_fc.shape[1]

    x_isz = jnp.dtype(x.dtype).itemsize
    w_isz = jnp.dtype(w_feat.dtype).itemsize
    feat_dtype = w_feat.dtype
    f_isz = jnp.dtype(feat_dtype).itemsize

    # --- batch tiling: only the batch dim is padded (to the sublane multiple /
    # tile size); lane dims stay unpadded as full-array blocks.
    B8 = _round_up(B, _SUBLANE)
    TB = min(_round_up(batch_tile, _SUBLANE), B8)
    if B8 > _SUBLANE:                       # give the v7x megacore >= 2 steps
        TB = min(TB, _round_up(pl.cdiv(B8, 2), _SUBLANE))

    # --- generation-aware VMEM budget; shrink TB until the tile fits.
    budget = _vmem_budget_bytes()
    weight_bytes = (w_feat.size * w_isz + w_fc.size * w_isz
                    + b_feat.size * 4 + b_fc.size * 4)

    def _tile_bytes(tb):
        io = tb * D_in * x_isz + tb * H * 4
        if return_feature:
            io += tb * F_dim * f_isz
        return 2 * io + tb * F_dim * 4      # + f32 feature intermediate

    headroom = 2 << 20
    while TB > _SUBLANE and 2 * weight_bytes + _tile_bytes(TB) + headroom > budget:
        TB = max(_SUBLANE, _round_up(TB // 2, _SUBLANE))

    if 2 * weight_bytes + _tile_bytes(TB) + headroom > budget:
        # TODO(synk): add a K-tiled Pallas variant (grid over D_in / fc_in_dim
        # with an f32 accumulator scratch) for weights too large to stay
        # VMEM-resident; fall back to plain XLA so huge shapes still run.
        feat = jnp.maximum(
            jnp.dot(x.astype(feat_dtype), w_feat,
                    preferred_element_type=jnp.float32) + b_feat, 0.0)
        y = jnp.dot(feat.astype(feat_dtype), w_fc,
                    preferred_element_type=jnp.float32) + b_fc
        return (y, feat.astype(feat_dtype)) if return_feature else y

    B_pad = _round_up(B8, TB)
    n_tiles = B_pad // TB
    xp = x if B_pad == B else jnp.pad(x, ((0, B_pad - B), (0, 0)))

    in_specs = [
        pl.BlockSpec((TB, D_in), lambda i: (i, 0)),   # x: tiled over batch
        _const_spec((D_in, F_dim)),                   # Wf: VMEM-resident
        _const_spec((1, F_dim)),                      # bf
        _const_spec((F_dim, H)),                      # Wh
        _const_spec((1, H)),                          # bh
    ]
    y_spec = pl.BlockSpec((TB, H), lambda i: (i, 0))
    feat_spec = pl.BlockSpec((TB, F_dim), lambda i: (i, 0))

    compiler_params = pltpu.CompilerParams(
        dimension_semantics=("parallel",),            # megacore-shards batch
        vmem_limit_bytes=int(budget),
    )

    out_bytes = B_pad * H * 4 + (B_pad * F_dim * f_isz if return_feature else 0)
    cost = pl.CostEstimate(
        flops=2 * B * (D_in * F_dim + F_dim * H),
        transcendentals=0,
        bytes_accessed=int(xp.size * x_isz + weight_bytes + out_bytes),
    )

    if return_feature:
        y_p, feat_p = pl.pallas_call(
            _regress_kernel_with_feature,
            out_shape=(jax.ShapeDtypeStruct((B_pad, H), jnp.float32),
                       jax.ShapeDtypeStruct((B_pad, F_dim), feat_dtype)),
            grid_spec=pltpu.PrefetchScalarGridSpec(
                num_scalar_prefetch=0, grid=(n_tiles,),
                in_specs=in_specs, out_specs=(y_spec, feat_spec)),
            compiler_params=compiler_params,
            cost_estimate=cost,
        )(xp, w_feat, b_feat, w_fc, b_fc)
        if B_pad != B:
            y_p, feat_p = y_p[:B], feat_p[:B]
        return y_p, feat_p

    y_p = pl.pallas_call(
        _regress_kernel_no_feature,
        out_shape=jax.ShapeDtypeStruct((B_pad, H), jnp.float32),
        grid_spec=pltpu.PrefetchScalarGridSpec(
            num_scalar_prefetch=0, grid=(n_tiles,),
            in_specs=in_specs, out_specs=y_spec),
        compiler_params=compiler_params,
        cost_estimate=cost,
    )(xp, w_feat, b_feat, w_fc, b_fc)
    return y_p[:B] if B_pad != B else y_p


if __name__ == "__main__":
    # Small shapes consistent with the module: batch=8, input dim=32,
    # fc_in_dim=32 (feature dim), num_head=1.
    B, D_IN, FC_IN_DIM, NUM_HEAD = 8, 32, 32, 1

    key = jax.random.PRNGKey(0)
    kx, kwf, kbf, kwh, kbh = jax.random.split(key, 5)

    x = jax.random.normal(kx, (B, D_IN), dtype=jnp.float32)

    # Synthetic parameters (PyTorch Linear weight [out, in] stored here
    # already transposed to [in, out]; biases 1-D like PyTorch).
    w_feat = jax.random.normal(kwf, (D_IN, FC_IN_DIM), dtype=jnp.float32) * 0.1
    b_feat = jax.random.normal(kbf, (FC_IN_DIM,), dtype=jnp.float32) * 0.1
    w_fc = jax.random.normal(kwh, (FC_IN_DIM, NUM_HEAD), dtype=jnp.float32) * 0.1
    b_fc = jax.random.normal(kbh, (NUM_HEAD,), dtype=jnp.float32) * 0.1

    # One-time (hoisted) parameter preparation.
    params = prepare_regress_params(w_feat, b_feat, w_fc, b_fc)

    # return_feature=True path.
    y_hat, feature = regress_forward(x, *params, return_feature=True)
    # return_feature=False path (feature never leaves VMEM).
    y_only = regress_forward(x, *params, return_feature=False)
    jax.block_until_ready((y_hat, feature, y_only))

    # Pure-JAX reference with matching bf16 weight quantization.
    f32, bf16 = jnp.float32, jnp.bfloat16
    x_q = x.astype(bf16).astype(f32)
    wf_q = w_feat.astype(bf16).astype(f32)
    wh_q = w_fc.astype(bf16).astype(f32)
    feat_ref_f32 = jnp.maximum(x_q @ wf_q + b_feat[None, :], 0.0)
    feat_ref_bf = feat_ref_f32.astype(bf16)
    y_ref = feat_ref_bf.astype(f32) @ wh_q + b_fc[None, :]

    assert y_hat.shape == (B, NUM_HEAD)
    assert feature.shape == (B, FC_IN_DIM)
    assert y_only.shape == (B, NUM_HEAD)
    assert jnp.allclose(y_hat, y_ref, atol=1e-2, rtol=1e-2)
    assert jnp.allclose(y_only, y_ref, atol=1e-2, rtol=1e-2)
    assert jnp.allclose(feature.astype(f32), feat_ref_f32, atol=2e-2, rtol=2e-2)

    print("KERNEL_OK")
</pallas_src>

<mosaic_0001>
module attributes {stable_mosaic.version = 11 : i64} {
  func.func @_regress_kernel_with_feature(%arg0: i32, %arg1: memref<8x32xf32, #tpu.memory_space<vmem>>, %arg2: memref<32x32xbf16, #tpu.memory_space<vmem>>, %arg3: memref<1x32xf32, #tpu.memory_space<vmem>>, %arg4: memref<32x1xbf16, #tpu.memory_space<vmem>>, %arg5: memref<1x1xf32, #tpu.memory_space<vmem>>, %arg6: memref<8x1xf32, #tpu.memory_space<vmem>>, %arg7: memref<8x32xbf16, #tpu.memory_space<vmem>>) attributes {dimension_semantics = [#tpu.dimension_semantics<parallel>], iteration_bounds = array<i64: 1>, scalar_prefetch = 0 : i64, scratch_operands = 0 : i64, tpu.core_type = #tpu.core_type<tc>, window_params = [{transform_indices = @transform_0, window_bounds = array<i64: 8, 32>}, {pipeline_mode = #tpu.pipeline_mode<synchronous>, transform_indices = @transform_1, window_bounds = array<i64: 32, 32>}, {pipeline_mode = #tpu.pipeline_mode<synchronous>, transform_indices = @transform_2, window_bounds = array<i64: 1, 32>}, {pipeline_mode = #tpu.pipeline_mode<synchronous>, transform_indices = @transform_3, window_bounds = array<i64: 32, 1>}, {pipeline_mode = #tpu.pipeline_mode<synchronous>, transform_indices = @transform_4, window_bounds = array<i64: 1, 1>}, {transform_indices = @transform_5, window_bounds = array<i64: 8, 1>}, {transform_indices = @transform_6, window_bounds = array<i64: 8, 32>}]} {
    %c0 = arith.constant 0 : index
    %c0_0 = arith.constant 0 : index
    %0 = vector.load %arg1[%c0, %c0_0] : memref<8x32xf32, #tpu.memory_space<vmem>>, vector<8x32xf32>
    %1 = arith.truncf %0 : vector<8x32xf32> to vector<8x32xbf16>
    %c0_1 = arith.constant 0 : index
    %c0_2 = arith.constant 0 : index
    %2 = vector.load %arg2[%c0_1, %c0_2] : memref<32x32xbf16, #tpu.memory_space<vmem>>, vector<32x32xbf16>
    %cst = arith.constant dense<0.000000e+00> : vector<8x32xf32>
    %3 = tpu.matmul %1, %2, %cst {dimension_numbers = #tpu.dot_dimension_numbers<[1], [0], [0], [1], [0, 0, 1, 1], [], []>} : vector<8x32xbf16>, vector<32x32xbf16>, vector<8x32xf32> -> vector<8x32xf32>
    %c0_3 = arith.constant 0 : index
    %c0_4 = arith.constant 0 : index
    %4 = vector.load %arg3[%c0_3, %c0_4] : memref<1x32xf32, #tpu.memory_space<vmem>>, vector<1x32xf32>
    %5 = vector.broadcast %4 : vector<1x32xf32> to vector<8x32xf32>
    %6 = arith.addf %3, %5 : vector<8x32xf32>
    %cst_5 = arith.constant 0.000000e+00 : f32
    %7 = vector.broadcast %cst_5 : f32 to vector<8x32xf32>
    %8 = arith.maximumf %6, %7 : vector<8x32xf32>
    %9 = arith.truncf %8 : vector<8x32xf32> to vector<8x32xbf16>
    %c0_6 = arith.constant 0 : index
    %c0_7 = arith.constant 0 : index
    %10 = vector.load %arg7[%c0_6, %c0_7] : memref<8x32xbf16, #tpu.memory_space<vmem>>, vector<8x32xbf16>
    tpu.vector_store %arg7[%c0_6, %c0_7], %9 {strides = array<i32>} : memref<8x32xbf16, #tpu.memory_space<vmem>>, vector<8x32xbf16>,
    %c0_8 = arith.constant 0 : index
    %c0_9 = arith.constant 0 : index
    %11 = vector.load %arg4[%c0_8, %c0_9] : memref<32x1xbf16, #tpu.memory_space<vmem>>, vector<32x1xbf16>
    %cst_10 = arith.constant dense<0.000000e+00> : vector<8x1xf32>
    %12 = tpu.matmul %9, %11, %cst_10 {dimension_numbers = #tpu.dot_dimension_numbers<[1], [0], [0], [1], [0, 0, 1, 1], [], []>} : vector<8x32xbf16>, vector<32x1xbf16>, vector<8x1xf32> -> vector<8x1xf32>
    %c0_11 = arith.constant 0 : index
    %c0_12 = arith.constant 0 : index
    %13 = vector.load %arg5[%c0_11, %c0_12] : memref<1x1xf32, #tpu.memory_space<vmem>>, vector<1x1xf32>
    %14 = vector.broadcast %13 : vector<1x1xf32> to vector<8x1xf32>
    %15 = arith.addf %12, %14 : vector<8x1xf32>
    %c0_13 = arith.constant 0 : index
    %c0_14 = arith.constant 0 : index
    %16 = vector.load %arg6[%c0_13, %c0_14] : memref<8x1xf32, #tpu.memory_space<vmem>>, vector<8x1xf32>
    tpu.vector_store %arg6[%c0_13, %c0_14], %15 {strides = array<i32>} : memref<8x1xf32, #tpu.memory_space<vmem>>, vector<8x1xf32>,
    return
  }
  func.func @transform_0(%arg0: i32) -> (i32, i32) {
    %c0_i32 = arith.constant 0 : i32
    %c0_i32_0 = arith.constant 0 : i32
    return %arg0, %c0_i32 : i32, i32
  }
  func.func @transform_1(%arg0: i32) -> (i32, i32) {
    %c0_i32 = arith.constant 0 : i32
    %c0_i32_0 = arith.constant 0 : i32
    %c0_i32_1 = arith.constant 0 : i32
    return %c0_i32, %c0_i32_0 : i32, i32
  }
  func.func @transform_2(%arg0: i32) -> (i32, i32) {
    %c0_i32 = arith.constant 0 : i32
    %c0_i32_0 = arith.constant 0 : i32
    %c0_i32_1 = arith.constant 0 : i32
    return %c0_i32, %c0_i32_0 : i32, i32
  }
  func.func @transform_3(%arg0: i32) -> (i32, i32) {
    %c0_i32 = arith.constant 0 : i32
    %c0_i32_0 = arith.constant 0 : i32
    %c0_i32_1 = arith.constant 0 : i32
    return %c0_i32, %c0_i32_0 : i32, i32
  }
  func.func @transform_4(%arg0: i32) -> (i32, i32) {
    %c0_i32 = arith.constant 0 : i32
    %c0_i32_0 = arith.constant 0 : i32
    %c0_i32_1 = arith.constant 0 : i32
    return %c0_i32, %c0_i32_0 : i32, i32
  }
  func.func @transform_5(%arg0: i32) -> (i32, i32) {
    %c0_i32 = arith.constant 0 : i32
    %c0_i32_0 = arith.constant 0 : i32
    return %arg0, %c0_i32 : i32, i32
  }
  func.func @transform_6(%arg0: i32) -> (i32, i32) {
    %c0_i32 = arith.constant 0 : i32
    %c0_i32_0 = arith.constant 0 : i32
    return %arg0, %c0_i32 : i32, i32
  }
}

</mosaic_0001>

<bundles_post_ra>
// kernel: regress_forward.1
= control target key start
LH: loop header
LB: loop body
LE: loop exit
PB: predicated region body
PF: predicated region fallthrough
CT: control target
= control target key end

     0   :  { %s322_s0 = inlined_call_operand.vmem [shape: f32[8,32], index: 0, kind: input, shape index: {}]   ;;  %s323_s1 = inlined_call_operand.vmem [shape: bf16[32,32], index: 1, kind: input, shape index: {}]   ;;  %s324_s2 = inlined_call_operand.vmem [shape: f32[1,32], index: 2, kind: input, shape index: {}]   ;;  %s325_s3 = inlined_call_operand.vmem [shape: bf16[32,1], index: 3, kind: input, shape index: {}]   ;;  %s326_s4 = inlined_call_operand.<no memory space> [shape: f32[1,1], index: 4, kind: input, shape index: {}]   ;;  %s327_s5 = inlined_call_operand.vmem [shape: f32[8,1], index: 5, kind: output, shape index: {0}]   ;;  %s328_s6 = inlined_call_operand.hbm [shape: bf16[8,32], index: 6, kind: output, shape index: {1}]  }
   0x1   :  { %v12_v0 = vstv %s326_s4 }
   0x2   :  { %13 = vst [vmem:[#allocation2] sm:$0x1] %v12_v0 }
   0x3   :  { %v218_v1 = vld [vmem:[%s323_s1] sm:$0xff]   ;;  %v246_v2 = vmov 0.0   ;;  %v219_v3 = vld [vmem:[%s323_s1 + $0x8] sm:$0xff]   ;;  %vm247_vm0 = vmmov 0  }
   0x4   :  { %199 = vmatprep.subr.bf16.mxu0 %v246_v2  ;;  %207 = vmatprep.subr.bf16.mxu1 %v246_v2  ;;  %v26_v4 = vld [vmem:[%s322_s0] sm:$0xff] }
   0x5   :  { %200 = vmatpush3.bf16.msra.mxu0 %v218_v1  ;;  %203 = vmatprep.mubr.msk.bf16.mxu0 %vm247_vm0, %v246_v2 }
   0x6   :  { %201 = vmatprep.subr.bf16.mxu0 %v246_v2  ;;  %211 = vmatprep.mubr.msk.bf16.mxu1 %vm247_vm0, %v246_v2 }
   0x7   :  { %14 = vsyncpa [#allocation4], 0  ;;  %v27_v5 = vpack.c.bf16 %v26_v4, %v26_v4  ;;  %vm51_vm1 = vcmask 261120   ;;  %v220_v6 = vld [vmem:[%s325_s3] sm:$0xff]   ;;  %v221_v7 = vld [vmem:[%s325_s3 + $0x8] sm:$0xff]   ;;  %vm97_vm2 = vcmask 257024  }
   0x8   :  { %208 = vmatpush3.bf16.msra.mxu1 %v220_v6  ;;  %v185_v8 = vld [vmem:[%s324_s2] ss:$0 sm:$0xff]  ;;  %s248_s8 = smov [#allocation3]  }
   0x9   :  { %202 = vmatpush3.bf16.msra.mxu0 %v219_v3  ;;  %209 = vmatprep.subr.bf16.mxu1 %v246_v2  ;;  %s175_s9 = sshll.u32 %s248_s8, 4  ;;  %s176_s9 = int_to_ptr.vmem [resolvable:$true] %s175_s9 }
   0xa   :  { %s222_s3 = scalar_lea.vmem %s176_s9, 64  ;;  %p227_p1 = scmp.lt.s32.totalorder %s176_s9, %s176_s9 }
   0xb   :  { %p223_p0 = scmp.ne.s32.totalorder %s176_s9, %s222_s3  ;;  %p228_p2 = scmp.lt.s32.totalorder %s222_s3, %s222_s3 }
   0xc   :  { %204 = vmatmul.mubr.msk.bf16.vlgmr.msra.gmra.mrb[0].mxu0 %vm51_vm1, %v27_v5  ;;  %210 = vmatpush3.bf16.msra.mxu1 %v221_v7 }
   0xd   :  { %p229_p3 = por %p228_p2, %p227_p1 }
   0xf   :  { %p230_p4 = pnand %p229_p3, %p223_p0 }
  0xdf   :  { %v89_v9 = vpop.f32.mrb[0].mxu0 }
  0xe0   :  { %v90_v10 = vadd.f32 %v185_v8, %v89_v9  ;;  %v205_v11 = vpop.f32.mrb[1].mxu0 }
  0xe1   :  { %v92_v12 = vpop.f32.mrb[2].mxu0 }
  0xe2   :  { %v95_v13 = vmax.f32 %v90_v10, 0.0  ;;  %v206_v14 = vpop.f32.mrb[3].mxu0 }
  0xe4   :  { %v96_v15 = vpack.c.bf16 %v95_v13, %v95_v13 }
  0xe6   :  { %212 = vmatmul.mubr.msk.bf16.vlgmr.msra.gmra.mrb[0].mxu1 %vm51_vm1, %v96_v15  ;;  %98 = vst.msk [vmem:[#allocation3] sm:$0xf] %vm97_vm2, %v96_v15 }
  0xe7   :  { %233 = shalt.err (!%p230_p4)
}
  0xe8   :  { %s234_s11 = scalar_lea.hbm %s328_s6, 64 }
  0xe9   :  { %p235_p5 = scmp.ne.s32.totalorder %s328_s6, %s234_s11  ;;  %p238_p6 = scmp.lt.u32.totalorder %s234_s11, %s328_s6 }
  0xeb   :  { %p240_p7 = pnand %p238_p6, %p235_p5 }
  0xed   :  { %243 = shalt.err (!%p240_p7)
}
  0xee   :  { %178 = dma.vmem_to_hbm [thread:$0]  %s176_s9, 64, %s328_s6, [#allocation4]   ;;  %v189_v16 = vld [vmem:[#allocation2] ss:$0 sm:$0xff]  ;;  %vm165_vm3 = vcmask 7168  }
 0x1b9   :  { %v159_v17 = vpop.f32.mrb[0].mxu1 }
 0x1ba   :  { %v160_v18 = vadd.f32 %v189_v16, %v159_v17  ;;  %v213_v19 = vpop.f32.mrb[1].mxu1 }
 0x1bb   :  { %v162_v20 = vpop.f32.mrb[2].mxu1 }
 0x1bc   :  { %166 = vst.msk [vmem:[%s327_s5] sm:$0xff] %vm165_vm3, %v160_v18  ;;  %v214_v21 = vpop.f32.mrb[3].mxu1 }
 0x1bd   :  { %244 = dma.done.wait [#allocation4], 64  }
 0x1be   :  { %245 = vsyncadd [#allocation4], 4294967232 }
 0x1bf   :  { %184 = vsyncpa [#allocation4], 1 }

</bundles_post_ra>
